<compile_context>
chip_gen: v5e
topology: v5e:2x2
jax: 0.10.0
libtpu: 0.0.40
codegen_flags: <defaults>
</compile_context>

<pallas_src>
import functools

import jax
import jax.numpy as jnp
from jax.experimental import pallas as pl
from jax.experimental.pallas import tpu as pltpu


def _round_up(x, m):
    return (x + m - 1) // m * m


def _head_kernel(x_ref, w_ref, b_ref, logits_ref, probs_ref):
    # x_ref: (TM, H) bf16   w_ref: (H, L) bf16   b_ref: (1, L) f32
    x = x_ref[...]
    w = w_ref[...]
    b = b_ref[...]

    # Linear output head: bf16 MXU matmul with f32 accumulation + f32 bias.
    logits = jnp.dot(x, w, preferred_element_type=jnp.float32) + b

    # Five dropout branches average to exactly this linear head at eval time,
    # so (l1 + ... + l5) / 5 == logits; kept as a no-op.

    # Numerically-stable softmax over the label axis; divide goes to the EUP.
    m = jnp.max(logits, axis=-1, keepdims=True)
    e = jnp.exp(logits - m)
    denom = jnp.sum(e, axis=-1, keepdims=True)
    probs = e * pl.reciprocal(denom, approx=True)

    logits_ref[...] = logits.astype(logits_ref.dtype)
    probs_ref[...] = probs.astype(probs_ref.dtype)


@functools.partial(jax.jit, static_argnames=("tile_m",))
def feedback_head(sequence_output, w_out, b_out, tile_m=512):
    """sequence_output: (B, S, H); w_out: (H, L); b_out: (L,)."""
    B, S, H = sequence_output.shape
    L = w_out.shape[1]
    N = B * S

    # Stream tokens in bf16 (halves HBM read traffic); tiny weights in bf16 too
    # so the MXU runs a native bf16 matmul with f32 accumulation.
    x = sequence_output.reshape(N, H).astype(jnp.bfloat16)
    w = w_out.astype(jnp.bfloat16)
    b2 = b_out.reshape(1, L).astype(jnp.float32)

    # Big row tiles amortize per-grid-step overhead; clamp for tiny N and pad
    # the token axis so every block is full (padded rows are sliced off below).
    tm = min(int(tile_m), _round_up(N, 8))
    n_pad = _round_up(N, tm)
    if n_pad != N:
        x = jnp.pad(x, ((0, n_pad - N), (0, 0)))
    grid = (n_pad // tm,)

    # Explicit scoped-VMEM budget: double-buffered x tile + double-buffered
    # output tiles + resident W/b, with 2x headroom, capped at v7x's 64 MiB.
    x_tile_bytes = tm * _round_up(H, 128) * 2            # bf16 x tile
    out_tile_bytes = tm * _round_up(L, 128) * 4          # f32 output tile
    resident_bytes = _round_up(H, 16) * _round_up(L, 128) * 2 + 8 * 128 * 4
    need = 2 * x_tile_bytes + 2 * 2 * out_tile_bytes + resident_bytes
    vmem_limit = int(min(max(2 * need, 16 << 20), 64 << 20))

    logits_flat, probs_flat = pl.pallas_call(
        _head_kernel,
        out_shape=(
            jax.ShapeDtypeStruct((n_pad, L), jnp.float32),
            jax.ShapeDtypeStruct((n_pad, L), jnp.float32),
        ),
        grid_spec=pltpu.PrefetchScalarGridSpec(
            num_scalar_prefetch=0,
            grid=grid,
            in_specs=[
                pl.BlockSpec((tm, H), lambda i: (i, 0)),
                # W and b are tiny: single resident VMEM copy, no pipelining /
                # double-buffer reservation.
                pl.BlockSpec(memory_space=pltpu.MemorySpace.VMEM),
                pl.BlockSpec(memory_space=pltpu.MemorySpace.VMEM),
            ],
            out_specs=[
                pl.BlockSpec((tm, L), lambda i: (i, 0)),
                pl.BlockSpec((tm, L), lambda i: (i, 0)),
            ],
        ),
        compiler_params=pltpu.CompilerParams(
            dimension_semantics=("parallel",),
            vmem_limit_bytes=vmem_limit,
        ),
    )(x, w, b2)

    logits = logits_flat[:N].reshape(B, S, L)
    probs = probs_flat[:N].reshape(B, S, L)
    return {"preds": probs, "logits": logits, "loss": 0, "metric": {}}


if __name__ == "__main__":
    # Small shapes consistent with the module: batch=2, seq=8, hidden=32,
    # num_labels=15 (matches FeedbackModel default num_labels).
    B, S, H, L, VOCAB = 2, 8, 32, 15, 100

    key = jax.random.PRNGKey(0)
    k_ids, k_emb, k_w, k_b = jax.random.split(key, 4)

    # Token ids + attention mask (mask unused by the softmax-decoder forward
    # path when targets are None).
    ids = jax.random.randint(k_ids, (B, S), 0, VOCAB, dtype=jnp.int32)
    mask = jnp.ones((B, S), dtype=jnp.int32)

    # Deterministic parameter init (synthetic weights, no checkpoint load).
    embedding = jax.random.normal(k_emb, (VOCAB, H), dtype=jnp.float32) * 0.02
    w_out = jax.random.normal(k_w, (H, L), dtype=jnp.float32) * 0.02
    b_out = jax.random.normal(k_b, (L,), dtype=jnp.float32) * 0.02

    # TODO(synk): transformer backbone stubbed with an embedding lookup
    # standing in for transformer_out.last_hidden_state.
    sequence_output = embedding[ids]  # (B, S, H)

    out = feedback_head(sequence_output, w_out, b_out)
    jax.block_until_ready(out["preds"])
    jax.block_until_ready(out["logits"])

    # Sanity check against plain-JAX reference at the same bf16 streaming
    # precision (kernel streams x / W in bf16, accumulates in f32).
    x_bf = sequence_output.reshape(-1, H).astype(jnp.bfloat16).astype(jnp.float32)
    w_bf = w_out.astype(jnp.bfloat16).astype(jnp.float32)
    ref_logits = x_bf @ w_bf + b_out
    ref_probs = jax.nn.softmax(ref_logits, axis=-1)
    assert jnp.allclose(out["logits"].reshape(-1, L), ref_logits, atol=1e-4)
    assert jnp.allclose(out["preds"].reshape(-1, L), ref_probs, atol=5e-3)
    assert jnp.allclose(jnp.sum(out["preds"], axis=-1), 1.0, atol=5e-3)

    print("KERNEL_OK")
</pallas_src>

<mosaic_0001>
module attributes {stable_mosaic.version = 11 : i64} {
  func.func @_head_kernel(%arg0: i32, %arg1: memref<16x32xbf16, #tpu.memory_space<vmem>>, %arg2: memref<32x15xbf16, #tpu.memory_space<vmem>>, %arg3: memref<1x15xf32, #tpu.memory_space<vmem>>, %arg4: memref<16x15xf32, #tpu.memory_space<vmem>>, %arg5: memref<16x15xf32, #tpu.memory_space<vmem>>) attributes {dimension_semantics = [#tpu.dimension_semantics<parallel>], iteration_bounds = array<i64: 1>, scalar_prefetch = 0 : i64, scratch_operands = 0 : i64, tpu.core_type = #tpu.core_type<tc>, window_params = [{transform_indices = @transform_0, window_bounds = array<i64: 16, 32>}, {pipeline_mode = #tpu.pipeline_mode<synchronous>, transform_indices = @transform_1, window_bounds = array<i64: 32, 15>}, {pipeline_mode = #tpu.pipeline_mode<synchronous>, transform_indices = @transform_2, window_bounds = array<i64: 1, 15>}, {transform_indices = @transform_3, window_bounds = array<i64: 16, 15>}, {transform_indices = @transform_4, window_bounds = array<i64: 16, 15>}]} {
    %c0 = arith.constant 0 : index
    %c0_0 = arith.constant 0 : index
    %0 = vector.load %arg1[%c0, %c0_0] : memref<16x32xbf16, #tpu.memory_space<vmem>>, vector<16x32xbf16>
    %c0_1 = arith.constant 0 : index
    %c0_2 = arith.constant 0 : index
    %1 = vector.load %arg2[%c0_1, %c0_2] : memref<32x15xbf16, #tpu.memory_space<vmem>>, vector<32x15xbf16>
    %c0_3 = arith.constant 0 : index
    %c0_4 = arith.constant 0 : index
    %2 = vector.load %arg3[%c0_3, %c0_4] : memref<1x15xf32, #tpu.memory_space<vmem>>, vector<1x15xf32>
    %cst = arith.constant dense<0.000000e+00> : vector<16x15xf32>
    %3 = tpu.matmul %0, %1, %cst {dimension_numbers = #tpu.dot_dimension_numbers<[1], [0], [0], [1], [0, 0, 1, 1], [], []>} : vector<16x32xbf16>, vector<32x15xbf16>, vector<16x15xf32> -> vector<16x15xf32>
    %4 = vector.broadcast %2 : vector<1x15xf32> to vector<16x15xf32>
    %5 = arith.addf %3, %4 : vector<16x15xf32>
    %cst_5 = arith.constant dense<0xFF800000> : vector<16xf32>
    %6 = vector.multi_reduction <maximumf>, %5, %cst_5 [1] : vector<16x15xf32> to vector<16xf32>
    %7 = vector.shape_cast %6 : vector<16xf32> to vector<16x1xf32>
    %8 = vector.broadcast %7 : vector<16x1xf32> to vector<16x15xf32>
    %9 = arith.subf %5, %8 : vector<16x15xf32>
    %10 = math.exp %9 : vector<16x15xf32>
    %cst_6 = arith.constant dense<0.000000e+00> : vector<16xf32>
    %11 = vector.multi_reduction <add>, %10, %cst_6 [1] : vector<16x15xf32> to vector<16xf32>
    %12 = vector.shape_cast %11 : vector<16xf32> to vector<16x1xf32>
    %13 = tpu.reciprocal %12 {approx = true} : vector<16x1xf32> -> vector<16x1xf32>
    %14 = vector.broadcast %13 : vector<16x1xf32> to vector<16x15xf32>
    %15 = arith.mulf %10, %14 : vector<16x15xf32>
    %c0_7 = arith.constant 0 : index
    %c0_8 = arith.constant 0 : index
    %16 = vector.load %arg4[%c0_7, %c0_8] : memref<16x15xf32, #tpu.memory_space<vmem>>, vector<16x15xf32>
    tpu.vector_store %arg4[%c0_7, %c0_8], %5 {strides = array<i32>} : memref<16x15xf32, #tpu.memory_space<vmem>>, vector<16x15xf32>,
    %c0_9 = arith.constant 0 : index
    %c0_10 = arith.constant 0 : index
    %17 = vector.load %arg5[%c0_9, %c0_10] : memref<16x15xf32, #tpu.memory_space<vmem>>, vector<16x15xf32>
    tpu.vector_store %arg5[%c0_9, %c0_10], %15 {strides = array<i32>} : memref<16x15xf32, #tpu.memory_space<vmem>>, vector<16x15xf32>,
    return
  }
  func.func @transform_0(%arg0: i32) -> (i32, i32) {
    %c0_i32 = arith.constant 0 : i32
    %c0_i32_0 = arith.constant 0 : i32
    return %arg0, %c0_i32 : i32, i32
  }
  func.func @transform_1(%arg0: i32) -> (i32, i32) {
    %c0_i32 = arith.constant 0 : i32
    %c0_i32_0 = arith.constant 0 : i32
    %c0_i32_1 = arith.constant 0 : i32
    return %c0_i32, %c0_i32_0 : i32, i32
  }
  func.func @transform_2(%arg0: i32) -> (i32, i32) {
    %c0_i32 = arith.constant 0 : i32
    %c0_i32_0 = arith.constant 0 : i32
    %c0_i32_1 = arith.constant 0 : i32
    return %c0_i32, %c0_i32_0 : i32, i32
  }
  func.func @transform_3(%arg0: i32) -> (i32, i32) {
    %c0_i32 = arith.constant 0 : i32
    %c0_i32_0 = arith.constant 0 : i32
    return %arg0, %c0_i32 : i32, i32
  }
  func.func @transform_4(%arg0: i32) -> (i32, i32) {
    %c0_i32 = arith.constant 0 : i32
    %c0_i32_0 = arith.constant 0 : i32
    return %arg0, %c0_i32 : i32, i32
  }
}

</mosaic_0001>

<bundles_post_ra>
// kernel: feedback_head.1
= control target key start
LH: loop header
LB: loop body
LE: loop exit
PB: predicated region body
PF: predicated region fallthrough
CT: control target
= control target key end

     0   :  { %10 = vsyncpa [#allocation3], 0  ;;  %s263_s0 = inlined_call_operand.vmem [shape: bf16[16,32], index: 0, kind: input, shape index: {}]   ;;  %s264_s1 = inlined_call_operand.vmem [shape: bf16[32,15], index: 1, kind: input, shape index: {}]   ;;  %s265_s2 = inlined_call_operand.vmem [shape: f32[1,15], index: 2, kind: input, shape index: {}]   ;;  %s266_s3 = inlined_call_operand.hbm [shape: f32[16,15], index: 3, kind: output, shape index: {0}]   ;;  %s267_s4 = inlined_call_operand.hbm [shape: f32[16,15], index: 4, kind: output, shape index: {1}]  }
   0x1   :  { %v142_v0 = vld [vmem:[%s264_s1 + $0x8] sm:$0xff] }
   0x2   :  { %11 = vsyncpa [#allocation5], 0  ;;  %56 = vmatpush.bf16.msra.mxu0 %v142_v0  ;;  %v141_v1 = vld [vmem:[%s264_s1] sm:$0xff]  ;;  %vm46_vm0 = vcmask 261120   ;;  %vm64_vm1 = vcmask 121856   ;;  %s97_s24 = sshll.u32 %s266_s3, 4  ;;  %s98_s24 = int_to_ptr.hbm [resolvable:$true] %s97_s24 }
   0x3   :  { %v140_v2 = vld [vmem:[%s263_s0] sm:$0xff]  ;;  %s208_s0 = smov [#allocation2]   ;;  %s209_s25 = smov 128  }
   0x4   :  { %v147_v3 = vld [vmem:[%s265_s2] ss:$0 sm:$0xff]  ;;  %s95_s1 = sshll.u32 %s208_s0, 4  ;;  %s210_s26 = smov 8   ;;  %s96_s1 = int_to_ptr.vmem [resolvable:$true] %s95_s1 }
   0x5   :  { %s211_s27 = smov [#allocation4]   ;;  %s110_s30 = sshll.u32 %s267_s4, 4  ;;  %s111_s30 = int_to_ptr.hbm [resolvable:$true] %s110_s30 }
   0x6   :  { %57 = vmatpush.bf16.msra.mxu0 %v141_v1  ;;  %s108_s28 = sshll.u32 %s211_s27, 4  ;;  %s109_s28 = int_to_ptr.vmem [resolvable:$true] %s108_s28 }
   0x9   :  { %139 = vmatmul.msk.bf16.vlgmr.msra.gmra.mxu0 %vm46_vm0, %v140_v2 }
  0x86   :  { %v59_v4 = vpop.f32.mrf.mxu0 }
  0x87   :  { %v60_v5 = vadd.f32 %v147_v3, %v59_v4 }
  0x89   :  { %87 = vst.msk [vmem:[#allocation2] sm:$0xff] %vm64_vm1, %v60_v5  ;;  %v65_v6 = vsel %vm64_vm1, %v60_v5, -inf }
  0x8a   :  { %66 = vmax.xlane.f32.xlu0 %v65_v6 }
  0x8e   :  { %v61_v7 = vpop.f32.mrf.mxu0 }
  0x8f   :  { %v62_v8 = vadd.f32 %v147_v3, %v61_v7 }
  0x91   :  { %88 = vst.msk [vmem:[#allocation2 + $0x8] sm:$0xff] %vm64_vm1, %v62_v8  ;;  %v68_v9 = vsel %vm64_vm1, %v62_v8, -inf }
  0x92   :  { %69 = vmax.xlane.f32.xlu0 %v68_v9  ;;  %103 = dma.vmem_to_hbm [thread:$0]  %s96_s1, 256, %s98_s24, [#allocation3], %s209_s25, %s209_s25, %s210_s26  }
  0xfd   :  { %v67_v10 = vpop.xlane.xlu0 %66 }
  0xfe   :  { %v71_v11 = vsub.f32 %v60_v5, %v67_v10 }
 0x100   :  { %v73_v12 = vmul.f32 1.442695, %v71_v11 }
 0x102   :  { %148 = vpow2.f32 %v73_v12 }
 0x105   :  { %v70_v13 = vpop.xlane.xlu0 %69 }
 0x106   :  { %v72_v14 = vsub.f32 %v62_v8, %v70_v13 }
 0x108   :  { %v149_v15 = vpop.eup %148  ;;  %v75_v16 = vmul.f32 1.442695, %v72_v14 }
 0x109   :  { %v77_v17 = vsel %vm64_vm1, %v149_v15, 0.0 }
 0x10a   :  { %150 = vpow2.f32 %v75_v16  ;;  %78 = vadd.xlane.f32.xlu1 %v77_v17 }
 0x110   :  { %v151_v18 = vpop.eup %150 }
 0x111   :  { %v80_v19 = vsel %vm64_vm1, %v151_v18, 0.0 }
 0x112   :  { %81 = vadd.xlane.f32.xlu1 %v80_v19 }
 0x17d   :  { %v79_v20 = vpop.xlane.xlu1 %78 }
 0x17e   :  { %152 = vrcp.f32 %v79_v20 }
 0x184   :  { %v153_v21 = vpop.eup %152 }
 0x185   :  { %v85_v22 = vmul.f32 %v153_v21, %v149_v15  ;;  %v82_v23 = vpop.xlane.xlu1 %81 }
 0x186   :  { %154 = vrcp.f32 %v82_v23 }
 0x187   :  { %89 = vst.msk [vmem:[#allocation4] sm:$0xff] %vm64_vm1, %v85_v22 }
 0x18c   :  { %v155_v24 = vpop.eup %154 }
 0x18d   :  { %v86_v25 = vmul.f32 %v155_v24, %v151_v18 }
 0x18f   :  { %90 = vst.msk [vmem:[#allocation4 + $0x8] sm:$0xff] %vm64_vm1, %v86_v25 }
 0x190   :  { %116 = dma.vmem_to_hbm [thread:$0]  %s109_s28, 256, %s111_s30, [#allocation5], %s209_s25, %s209_s25, %s210_s26  }
 0x191   :  { %204 = dma.done.wait [#allocation3], 256  }
 0x192   :  { %205 = vsyncadd [#allocation3], 4294967040 }
 0x193   :  { %206 = dma.done.wait [#allocation5], 256  }
 0x194   :  { %207 = vsyncadd [#allocation5], 4294967040 }
 0x195   :  { %125 = vsyncpa [#allocation3], 1 }
 0x196   :  { %126 = vsyncpa [#allocation5], 1 }

</bundles_post_ra>
